<compile_context>
chip_gen: v7x
topology: tpu7x:2x2x1
jax: 0.10.0
libtpu: 0.0.40
codegen_flags: <defaults>
</compile_context>

<pallas_src>
import functools

import jax
import jax.numpy as jnp
from jax.experimental import pallas as pl
from jax.experimental.pallas import tpu as pltpu


def _softmax_rows(a):
    """Softmax over axis 0 (channel rows) of a (C, P) slab."""
    m = jnp.max(a, axis=0, keepdims=True)
    e = jnp.exp(a - m)
    return e / jnp.sum(e, axis=0, keepdims=True)


def _sigmoid(x):
    # sigmoid(x) == 0.5 * (1 + tanh(x/2)); numerically stable, EUP-friendly.
    return 0.5 * (jnp.tanh(0.5 * x) + 1.0)


def _make_kernel(C, H, W, steps):
    P = H * W

    def kernel(x_ref, mask_ref, wg_ref, bg_ref, wo_ref, bo_ref, out_ref):
        # Loaded once; resident across every recurrence step (hoisted out of loop).
        wg = wg_ref[...]          # (4C, 9*2C)  gate conv weights, im2col layout
        bg = bg_ref[...]          # (4C, 1)
        wo = wo_ref[...]          # (C, C)      1x1 output conv, (out, in)
        bo = bo_ref[...]          # (C, 1)
        mask = mask_ref[...]      # (9, P)      1.0 where the shifted tap is in-bounds

        def step(_, carry):
            x, h, c = carry                                    # each (C, P)
            xs = _softmax_rows(x)
            hs = _softmax_rows(h)
            cs = _softmax_rows(c)
            comb = jnp.concatenate([xs, hs], axis=0)           # (2C, P)

            # im2col: 9 lane-rotated + border-masked copies of `comb`,
            # stacked to (9*2C, P) -> the 3x3 conv becomes one MXU matmul.
            taps = []
            for dy in range(3):
                for dx in range(3):
                    off = (dy - 1) * W + (dx - 1)
                    shifted = pltpu.roll(comb, (-off) % P, 1) if off else comb
                    t = dy * 3 + dx
                    taps.append(shifted * mask[t:t + 1, :])
            patches = jnp.concatenate(taps, axis=0)            # (9*2C, P)

            gates = jnp.dot(wg, patches,
                            preferred_element_type=jnp.float32) + bg   # (4C, P)

            i = _sigmoid(gates[0 * C:1 * C])
            f = _sigmoid(gates[1 * C:2 * C])
            o = _sigmoid(gates[2 * C:3 * C])
            g = jnp.tanh(gates[3 * C:4 * C])
            c_next = f * cs + i * g
            h_next = o * jnp.tanh(c_next)

            # 1x1 output conv: (C, C) @ (C, P) on the MXU.
            x_next = jnp.dot(wo, h_next,
                             preferred_element_type=jnp.float32) + bo
            return (x_next, h_next, c_next)

        x0 = x_ref[...]
        h0 = jnp.zeros_like(x0)
        c0 = jnp.zeros_like(x0)
        x_fin, _, _ = jax.lax.fori_loop(0, steps, step, (x0, h0, c0))
        out_ref[...] = x_fin

    return kernel


def _tap_masks(H, W):
    """(9, H*W) float32 validity masks for the 9 conv taps (zero padding)."""
    yy = jnp.arange(H, dtype=jnp.int32)[:, None]
    xx = jnp.arange(W, dtype=jnp.int32)[None, :]
    rows = []
    for dy in range(3):
        for dx in range(3):
            ok = ((yy + dy - 1 >= 0) & (yy + dy - 1 < H) &
                  (xx + dx - 1 >= 0) & (xx + dx - 1 < W))
            rows.append(ok.astype(jnp.float32).reshape(H * W))
    return jnp.stack(rows, axis=0)


@functools.partial(jax.jit, static_argnames=("steps",))
def ca_model_convlstm_forward(x_nchw, w_hwio, b, wo, bo, steps=1):
    """Mirrors CAModelConvLSTM.forward.  x_nchw: (N, C, H, W) float32."""
    N, C, H, W = x_nchw.shape
    P = H * W

    x = x_nchw.reshape(N, C, P).astype(jnp.float32)            # lane-dense pixel axis
    # HWIO (3,3,2C,4C) -> im2col weight (4C, 9*2C); row order matches the
    # kernel's tap order (dy, dx) and the concat order [xs; hs].
    wg = jnp.transpose(w_hwio.reshape(9 * 2 * C, 4 * C)).astype(jnp.float32)
    bg = b.reshape(4 * C, 1).astype(jnp.float32)
    wo_t = jnp.transpose(wo).astype(jnp.float32)               # (Cout, Cin)
    bo2 = bo.reshape(C, 1).astype(jnp.float32)
    masks = _tap_masks(H, W)

    out = pl.pallas_call(
        _make_kernel(C, H, W, steps),
        grid=(N,),
        in_specs=[
            pl.BlockSpec((None, C, P), lambda n: (n, 0, 0)),    # x for batch n
            pl.BlockSpec((9, P), lambda n: (0, 0)),             # tap masks
            pl.BlockSpec((4 * C, 9 * 2 * C), lambda n: (0, 0)),  # gate weights
            pl.BlockSpec((4 * C, 1), lambda n: (0, 0)),          # gate bias
            pl.BlockSpec((C, C), lambda n: (0, 0)),              # 1x1 conv weight
            pl.BlockSpec((C, 1), lambda n: (0, 0)),              # 1x1 conv bias
        ],
        out_specs=pl.BlockSpec((None, C, P), lambda n: (n, 0, 0)),
        out_shape=jax.ShapeDtypeStruct((N, C, P), jnp.float32),
        compiler_params=pltpu.CompilerParams(
            dimension_semantics=("parallel",)),                  # v7x: batch across TCs
    )(x, masks, wg, bg, wo_t, bo2)
    return out.reshape(N, C, H, W)


def reference_forward(x_nchw, w_hwio, b, wo, bo, steps=1):
    """Pure-JAX (XLA) reference for correctness checking."""
    C = x_nchw.shape[1]
    x = jnp.transpose(x_nchw, (0, 2, 3, 1)).astype(jnp.float32)   # NHWC
    h = jnp.zeros_like(x)
    c = jnp.zeros_like(x)
    for _ in range(steps):
        xs = jax.nn.softmax(x, axis=-1)
        hs = jax.nn.softmax(h, axis=-1)
        cs = jax.nn.softmax(c, axis=-1)
        comb = jnp.concatenate([xs, hs], axis=-1)
        gates = jax.lax.conv_general_dilated(
            comb, w_hwio, window_strides=(1, 1), padding=((1, 1), (1, 1)),
            dimension_numbers=('NHWC', 'HWIO', 'NHWC'),
            precision=jax.lax.Precision.HIGHEST) + b
        i = jax.nn.sigmoid(gates[..., 0:C])
        f = jax.nn.sigmoid(gates[..., C:2 * C])
        o = jax.nn.sigmoid(gates[..., 2 * C:3 * C])
        g = jnp.tanh(gates[..., 3 * C:4 * C])
        c = f * cs + i * g
        h = o * jnp.tanh(c)
        x = jnp.einsum('nhwc,cd->nhwd', h, wo,
                       precision=jax.lax.Precision.HIGHEST) + bo
    return jnp.transpose(x, (0, 3, 1, 2))


if __name__ == "__main__":
    N, C, H, W = 2, 4, 16, 16          # num_states = 4
    steps = 2

    key = jax.random.PRNGKey(0)
    k1, k2, k3, k4, k5 = jax.random.split(key, 5)
    x = jax.random.normal(k1, (N, C, H, W), jnp.float32)
    # ConvLSTMCell conv: in = 2C, out = 4C, 3x3, padding 1 (HWIO layout here).
    w_hwio = jax.random.normal(k2, (3, 3, 2 * C, 4 * C), jnp.float32) * 0.1
    b = jax.random.normal(k3, (4 * C,), jnp.float32) * 0.1
    # output_lyr: 1x1 conv C -> C, stored as (Cin, Cout).
    wo = jax.random.normal(k4, (C, C), jnp.float32) * 0.1
    bo = jax.random.normal(k5, (C,), jnp.float32) * 0.1

    out = ca_model_convlstm_forward(x, w_hwio, b, wo, bo, steps=steps)
    out = jax.block_until_ready(out)
    assert out.shape == (N, C, H, W)

    ref = reference_forward(x, w_hwio, b, wo, bo, steps=steps)
    err = float(jnp.max(jnp.abs(out - ref)))
    if err > 1e-4:
        raise AssertionError(f"Pallas kernel mismatch vs reference: max|diff|={err}")

    print("KERNEL_OK")
</pallas_src>

<mosaic_0001>
module attributes {stable_mosaic.version = 11 : i64} {
  func.func @kernel(%arg0: i32, %arg1: memref<1x4x256xf32, #tpu.memory_space<vmem>>, %arg2: memref<9x256xf32, #tpu.memory_space<vmem>>, %arg3: memref<16x72xf32, #tpu.memory_space<vmem>>, %arg4: memref<16x1xf32, #tpu.memory_space<vmem>>, %arg5: memref<4x4xf32, #tpu.memory_space<vmem>>, %arg6: memref<4x1xf32, #tpu.memory_space<vmem>>, %arg7: memref<1x4x256xf32, #tpu.memory_space<vmem>>) attributes {dimension_semantics = [#tpu.dimension_semantics<parallel>], iteration_bounds = array<i64: 2>, scalar_prefetch = 0 : i64, scratch_operands = 0 : i64, tpu.core_type = #tpu.core_type<tc>, window_params = [{transform_indices = @transform_0, window_bounds = array<i64: 1, 4, 256>}, {pipeline_mode = #tpu.pipeline_mode<synchronous>, transform_indices = @transform_1, window_bounds = array<i64: 9, 256>}, {pipeline_mode = #tpu.pipeline_mode<synchronous>, transform_indices = @transform_2, window_bounds = array<i64: 16, 72>}, {pipeline_mode = #tpu.pipeline_mode<synchronous>, transform_indices = @transform_3, window_bounds = array<i64: 16, 1>}, {pipeline_mode = #tpu.pipeline_mode<synchronous>, transform_indices = @transform_4, window_bounds = array<i64: 4, 4>}, {pipeline_mode = #tpu.pipeline_mode<synchronous>, transform_indices = @transform_5, window_bounds = array<i64: 4, 1>}, {transform_indices = @transform_6, window_bounds = array<i64: 1, 4, 256>}]} {
    %c0 = arith.constant 0 : index
    %c0_0 = arith.constant 0 : index
    %0 = vector.load %arg3[%c0, %c0_0] : memref<16x72xf32, #tpu.memory_space<vmem>>, vector<16x72xf32>
    %c0_1 = arith.constant 0 : index
    %c0_2 = arith.constant 0 : index
    %1 = vector.load %arg4[%c0_1, %c0_2] : memref<16x1xf32, #tpu.memory_space<vmem>>, vector<16x1xf32>
    %c0_3 = arith.constant 0 : index
    %c0_4 = arith.constant 0 : index
    %2 = vector.load %arg5[%c0_3, %c0_4] : memref<4x4xf32, #tpu.memory_space<vmem>>, vector<4x4xf32>
    %c0_5 = arith.constant 0 : index
    %c0_6 = arith.constant 0 : index
    %3 = vector.load %arg6[%c0_5, %c0_6] : memref<4x1xf32, #tpu.memory_space<vmem>>, vector<4x1xf32>
    %c0_7 = arith.constant 0 : index
    %c0_8 = arith.constant 0 : index
    %4 = vector.load %arg2[%c0_7, %c0_8] : memref<9x256xf32, #tpu.memory_space<vmem>>, vector<9x256xf32>
    %c0_9 = arith.constant 0 : index
    %c0_10 = arith.constant 0 : index
    %c0_11 = arith.constant 0 : index
    %5 = vector.load %arg1[%c0_9, %c0_10, %c0_11] : memref<1x4x256xf32, #tpu.memory_space<vmem>>, vector<1x4x256xf32>
    %6 = vector.shape_cast %5 : vector<1x4x256xf32> to vector<4x256xf32>
    %cst = arith.constant 0.000000e+00 : f32
    %7 = vector.broadcast %cst : f32 to vector<4x256xf32>
    %cst_12 = arith.constant 0.000000e+00 : f32
    %8 = vector.broadcast %cst_12 : f32 to vector<4x256xf32>
    %c0_i32 = arith.constant 0 : i32
    %c2_i32 = arith.constant 2 : i32
    %9 = arith.addi %c0_i32, %c2_i32 : i32
    %c1_i32 = arith.constant 1 : i32
    %10:3 = scf.for %arg8 = %c0_i32 to %9 step %c1_i32 iter_args(%arg9 = %6, %arg10 = %7, %arg11 = %8) -> (vector<4x256xf32>, vector<4x256xf32>, vector<4x256xf32>)  : i32 {
      %cst_16 = arith.constant dense<0xFF800000> : vector<256xf32>
      %14 = vector.multi_reduction <maximumf>, %arg9, %cst_16 [0] : vector<4x256xf32> to vector<256xf32>
      %15 = vector.shape_cast %14 : vector<256xf32> to vector<1x256xf32>
      %16 = vector.broadcast %15 : vector<1x256xf32> to vector<4x256xf32>
      %17 = arith.subf %arg9, %16 : vector<4x256xf32>
      %18 = math.exp %17 : vector<4x256xf32>
      %cst_17 = arith.constant dense<0.000000e+00> : vector<256xf32>
      %19 = vector.multi_reduction <add>, %18, %cst_17 [0] : vector<4x256xf32> to vector<256xf32>
      %20 = vector.shape_cast %19 : vector<256xf32> to vector<1x256xf32>
      %21 = vector.broadcast %20 : vector<1x256xf32> to vector<4x256xf32>
      %22 = arith.divf %18, %21 : vector<4x256xf32>
      %cst_18 = arith.constant dense<0xFF800000> : vector<256xf32>
      %23 = vector.multi_reduction <maximumf>, %arg10, %cst_18 [0] : vector<4x256xf32> to vector<256xf32>
      %24 = vector.shape_cast %23 : vector<256xf32> to vector<1x256xf32>
      %25 = vector.broadcast %24 : vector<1x256xf32> to vector<4x256xf32>
      %26 = arith.subf %arg10, %25 : vector<4x256xf32>
      %27 = math.exp %26 : vector<4x256xf32>
      %cst_19 = arith.constant dense<0.000000e+00> : vector<256xf32>
      %28 = vector.multi_reduction <add>, %27, %cst_19 [0] : vector<4x256xf32> to vector<256xf32>
      %29 = vector.shape_cast %28 : vector<256xf32> to vector<1x256xf32>
      %30 = vector.broadcast %29 : vector<1x256xf32> to vector<4x256xf32>
      %31 = arith.divf %27, %30 : vector<4x256xf32>
      %cst_20 = arith.constant dense<0xFF800000> : vector<256xf32>
      %32 = vector.multi_reduction <maximumf>, %arg11, %cst_20 [0] : vector<4x256xf32> to vector<256xf32>
      %33 = vector.shape_cast %32 : vector<256xf32> to vector<1x256xf32>
      %34 = vector.broadcast %33 : vector<1x256xf32> to vector<4x256xf32>
      %35 = arith.subf %arg11, %34 : vector<4x256xf32>
      %36 = math.exp %35 : vector<4x256xf32>
      %cst_21 = arith.constant dense<0.000000e+00> : vector<256xf32>
      %37 = vector.multi_reduction <add>, %36, %cst_21 [0] : vector<4x256xf32> to vector<256xf32>
      %38 = vector.shape_cast %37 : vector<256xf32> to vector<1x256xf32>
      %39 = vector.broadcast %38 : vector<1x256xf32> to vector<4x256xf32>
      %40 = arith.divf %36, %39 : vector<4x256xf32>
      %41 = tpu.concatenate %22, %31 in 0 : vector<4x256xf32>, vector<4x256xf32> -> vector<8x256xf32>
      %c17_i32 = arith.constant 17 : i32
      %42 = tpu.dynamic_rotate %41 by %c17_i32 dim 1 : vector<8x256xf32>, i32 -> vector<8x256xf32>
      %43 = vector.extract_strided_slice %4 {offsets = [0, 0], sizes = [1, 256], strides = [1, 1]} : vector<9x256xf32> to vector<1x256xf32>
      %44 = vector.broadcast %43 : vector<1x256xf32> to vector<8x256xf32>
      %45 = arith.mulf %42, %44 : vector<8x256xf32>
      %c16_i32 = arith.constant 16 : i32
      %46 = tpu.dynamic_rotate %41 by %c16_i32 dim 1 : vector<8x256xf32>, i32 -> vector<8x256xf32>
      %47 = vector.extract_strided_slice %4 {offsets = [1, 0], sizes = [1, 256], strides = [1, 1]} : vector<9x256xf32> to vector<1x256xf32>
      %48 = vector.broadcast %47 : vector<1x256xf32> to vector<8x256xf32>
      %49 = arith.mulf %46, %48 : vector<8x256xf32>
      %c15_i32 = arith.constant 15 : i32
      %50 = tpu.dynamic_rotate %41 by %c15_i32 dim 1 : vector<8x256xf32>, i32 -> vector<8x256xf32>
      %51 = vector.extract_strided_slice %4 {offsets = [2, 0], sizes = [1, 256], strides = [1, 1]} : vector<9x256xf32> to vector<1x256xf32>
      %52 = vector.broadcast %51 : vector<1x256xf32> to vector<8x256xf32>
      %53 = arith.mulf %50, %52 : vector<8x256xf32>
      %c1_i32_22 = arith.constant 1 : i32
      %54 = tpu.dynamic_rotate %41 by %c1_i32_22 dim 1 : vector<8x256xf32>, i32 -> vector<8x256xf32>
      %55 = vector.extract_strided_slice %4 {offsets = [3, 0], sizes = [1, 256], strides = [1, 1]} : vector<9x256xf32> to vector<1x256xf32>
      %56 = vector.broadcast %55 : vector<1x256xf32> to vector<8x256xf32>
      %57 = arith.mulf %54, %56 : vector<8x256xf32>
      %58 = vector.extract_strided_slice %4 {offsets = [4, 0], sizes = [1, 256], strides = [1, 1]} : vector<9x256xf32> to vector<1x256xf32>
      %59 = vector.broadcast %58 : vector<1x256xf32> to vector<8x256xf32>
      %60 = arith.mulf %41, %59 : vector<8x256xf32>
      %c255_i32 = arith.constant 255 : i32
      %61 = tpu.dynamic_rotate %41 by %c255_i32 dim 1 : vector<8x256xf32>, i32 -> vector<8x256xf32>
      %62 = vector.extract_strided_slice %4 {offsets = [5, 0], sizes = [1, 256], strides = [1, 1]} : vector<9x256xf32> to vector<1x256xf32>
      %63 = vector.broadcast %62 : vector<1x256xf32> to vector<8x256xf32>
      %64 = arith.mulf %61, %63 : vector<8x256xf32>
      %c241_i32 = arith.constant 241 : i32
      %65 = tpu.dynamic_rotate %41 by %c241_i32 dim 1 : vector<8x256xf32>, i32 -> vector<8x256xf32>
      %66 = vector.extract_strided_slice %4 {offsets = [6, 0], sizes = [1, 256], strides = [1, 1]} : vector<9x256xf32> to vector<1x256xf32>
      %67 = vector.broadcast %66 : vector<1x256xf32> to vector<8x256xf32>
      %68 = arith.mulf %65, %67 : vector<8x256xf32>
      %c240_i32 = arith.constant 240 : i32
      %69 = tpu.dynamic_rotate %41 by %c240_i32 dim 1 : vector<8x256xf32>, i32 -> vector<8x256xf32>
      %70 = vector.extract_strided_slice %4 {offsets = [7, 0], sizes = [1, 256], strides = [1, 1]} : vector<9x256xf32> to vector<1x256xf32>
      %71 = vector.broadcast %70 : vector<1x256xf32> to vector<8x256xf32>
      %72 = arith.mulf %69, %71 : vector<8x256xf32>
      %c239_i32 = arith.constant 239 : i32
      %73 = tpu.dynamic_rotate %41 by %c239_i32 dim 1 : vector<8x256xf32>, i32 -> vector<8x256xf32>
      %74 = vector.extract_strided_slice %4 {offsets = [8, 0], sizes = [1, 256], strides = [1, 1]} : vector<9x256xf32> to vector<1x256xf32>
      %75 = vector.broadcast %74 : vector<1x256xf32> to vector<8x256xf32>
      %76 = arith.mulf %73, %75 : vector<8x256xf32>
      %77 = tpu.concatenate %45, %49, %53, %57, %60, %64, %68, %72, %76 in 0 : vector<8x256xf32>, vector<8x256xf32>, vector<8x256xf32>, vector<8x256xf32>, vector<8x256xf32>, vector<8x256xf32>, vector<8x256xf32>, vector<8x256xf32>, vector<8x256xf32> -> vector<72x256xf32>
      %cst_23 = arith.constant dense<0.000000e+00> : vector<16x256xf32>
      %78 = tpu.matmul %0, %77, %cst_23 {dimension_numbers = #tpu.dot_dimension_numbers<[1], [0], [0], [1], [0, 0, 1, 1], [], []>} : vector<16x72xf32>, vector<72x256xf32>, vector<16x256xf32> -> vector<16x256xf32>
      %79 = vector.broadcast %1 : vector<16x1xf32> to vector<16x256xf32>
      %80 = arith.addf %78, %79 : vector<16x256xf32>
      %81 = vector.extract_strided_slice %80 {offsets = [0, 0], sizes = [4, 256], strides = [1, 1]} : vector<16x256xf32> to vector<4x256xf32>
      %cst_24 = arith.constant 5.000000e-01 : f32
      %82 = vector.broadcast %cst_24 : f32 to vector<4x256xf32>
      %83 = arith.mulf %82, %81 : vector<4x256xf32>
      %84 = math.tanh %83 : vector<4x256xf32>
      %cst_25 = arith.constant 1.000000e+00 : f32
      %85 = vector.broadcast %cst_25 : f32 to vector<4x256xf32>
      %86 = arith.addf %84, %85 : vector<4x256xf32>
      %cst_26 = arith.constant 5.000000e-01 : f32
      %87 = vector.broadcast %cst_26 : f32 to vector<4x256xf32>
      %88 = arith.mulf %87, %86 : vector<4x256xf32>
      %89 = vector.extract_strided_slice %80 {offsets = [4, 0], sizes = [4, 256], strides = [1, 1]} : vector<16x256xf32> to vector<4x256xf32>
      %cst_27 = arith.constant 5.000000e-01 : f32
      %90 = vector.broadcast %cst_27 : f32 to vector<4x256xf32>
      %91 = arith.mulf %90, %89 : vector<4x256xf32>
      %92 = math.tanh %91 : vector<4x256xf32>
      %cst_28 = arith.constant 1.000000e+00 : f32
      %93 = vector.broadcast %cst_28 : f32 to vector<4x256xf32>
      %94 = arith.addf %92, %93 : vector<4x256xf32>
      %cst_29 = arith.constant 5.000000e-01 : f32
      %95 = vector.broadcast %cst_29 : f32 to vector<4x256xf32>
      %96 = arith.mulf %95, %94 : vector<4x256xf32>
      %97 = vector.extract_strided_slice %80 {offsets = [8, 0], sizes = [4, 256], strides = [1, 1]} : vector<16x256xf32> to vector<4x256xf32>
      %cst_30 = arith.constant 5.000000e-01 : f32
      %98 = vector.broadcast %cst_30 : f32 to vector<4x256xf32>
      %99 = arith.mulf %98, %97 : vector<4x256xf32>
      %100 = math.tanh %99 : vector<4x256xf32>
      %cst_31 = arith.constant 1.000000e+00 : f32
      %101 = vector.broadcast %cst_31 : f32 to vector<4x256xf32>
      %102 = arith.addf %100, %101 : vector<4x256xf32>
      %cst_32 = arith.constant 5.000000e-01 : f32
      %103 = vector.broadcast %cst_32 : f32 to vector<4x256xf32>
      %104 = arith.mulf %103, %102 : vector<4x256xf32>
      %105 = vector.extract_strided_slice %80 {offsets = [12, 0], sizes = [4, 256], strides = [1, 1]} : vector<16x256xf32> to vector<4x256xf32>
      %106 = math.tanh %105 : vector<4x256xf32>
      %107 = arith.mulf %96, %40 : vector<4x256xf32>
      %108 = arith.mulf %88, %106 : vector<4x256xf32>
      %109 = arith.addf %107, %108 : vector<4x256xf32>
      %110 = math.tanh %109 : vector<4x256xf32>
      %111 = arith.mulf %104, %110 : vector<4x256xf32>
      %cst_33 = arith.constant dense<0.000000e+00> : vector<4x256xf32>
      %112 = tpu.matmul %2, %111, %cst_33 {dimension_numbers = #tpu.dot_dimension_numbers<[1], [0], [0], [1], [0, 0, 1, 1], [], []>} : vector<4x4xf32>, vector<4x256xf32>, vector<4x256xf32> -> vector<4x256xf32>
      %113 = vector.broadcast %3 : vector<4x1xf32> to vector<4x256xf32>
      %114 = arith.addf %112, %113 : vector<4x256xf32>
      scf.yield %114, %111, %109 : vector<4x256xf32>, vector<4x256xf32>, vector<4x256xf32>
    }
    %c0_13 = arith.constant 0 : index
    %c0_14 = arith.constant 0 : index
    %c0_15 = arith.constant 0 : index
    %11 = vector.load %arg7[%c0_13, %c0_14, %c0_15] : memref<1x4x256xf32, #tpu.memory_space<vmem>>, vector<1x4x256xf32>
    %12 = vector.shape_cast %11 : vector<1x4x256xf32> to vector<4x256xf32>
    %13 = vector.shape_cast %10#0 : vector<4x256xf32> to vector<1x4x256xf32>
    tpu.vector_store %arg7[%c0_13, %c0_14, %c0_15], %13 {strides = array<i32>} : memref<1x4x256xf32, #tpu.memory_space<vmem>>, vector<1x4x256xf32>,
    return
  }
  func.func @transform_0(%arg0: i32) -> (i32, i32, i32) {
    %c0_i32 = arith.constant 0 : i32
    %c0_i32_0 = arith.constant 0 : i32
    %c0_i32_1 = arith.constant 0 : i32
    return %arg0, %c0_i32, %c0_i32_0 : i32, i32, i32
  }
  func.func @transform_1(%arg0: i32) -> (i32, i32) {
    %c0_i32 = arith.constant 0 : i32
    %c0_i32_0 = arith.constant 0 : i32
    %c0_i32_1 = arith.constant 0 : i32
    return %c0_i32, %c0_i32_0 : i32, i32
  }
  func.func @transform_2(%arg0: i32) -> (i32, i32) {
    %c0_i32 = arith.constant 0 : i32
    %c0_i32_0 = arith.constant 0 : i32
    %c0_i32_1 = arith.constant 0 : i32
    return %c0_i32, %c0_i32_0 : i32, i32
  }
  func.func @transform_3(%arg0: i32) -> (i32, i32) {
    %c0_i32 = arith.constant 0 : i32
    %c0_i32_0 = arith.constant 0 : i32
    %c0_i32_1 = arith.constant 0 : i32
    return %c0_i32, %c0_i32_0 : i32, i32
  }
  func.func @transform_4(%arg0: i32) -> (i32, i32) {
    %c0_i32 = arith.constant 0 : i32
    %c0_i32_0 = arith.constant 0 : i32
    %c0_i32_1 = arith.constant 0 : i32
    return %c0_i32, %c0_i32_0 : i32, i32
  }
  func.func @transform_5(%arg0: i32) -> (i32, i32) {
    %c0_i32 = arith.constant 0 : i32
    %c0_i32_0 = arith.constant 0 : i32
    %c0_i32_1 = arith.constant 0 : i32
    return %c0_i32, %c0_i32_0 : i32, i32
  }
  func.func @transform_6(%arg0: i32) -> (i32, i32, i32) {
    %c0_i32 = arith.constant 0 : i32
    %c0_i32_0 = arith.constant 0 : i32
    %c0_i32_1 = arith.constant 0 : i32
    return %arg0, %c0_i32, %c0_i32_0 : i32, i32, i32
  }
}

</mosaic_0001>

<bundles_post_ra>
// kernel: ca_model_convlstm_forward.1
= control target key start
LH: loop header
LB: loop body
LE: loop exit
PB: predicated region body
PF: predicated region fallthrough
CT: control target
= control target key end

     0   :  { %s1127_s21 = smov 0   ;;  %s1330_s0 = inlined_call_operand.vmem [shape: f32[2,4,256], index: 0, kind: input, shape index: {}]   ;;  %s1331_s1 = inlined_call_operand.vmem [shape: f32[9,256], index: 1, kind: input, shape index: {}]   ;;  %s1332_s2 = inlined_call_operand.vmem [shape: f32[16,72], index: 2, kind: input, shape index: {}]   ;;  %s1333_s3 = inlined_call_operand.vmem [shape: f32[16,1], index: 3, kind: input, shape index: {}]   ;;  %s1334_s4 = inlined_call_operand.vmem [shape: f32[4,4], index: 4, kind: input, shape index: {}]   ;;  %s1335_s5 = inlined_call_operand.vmem [shape: f32[4,1], index: 5, kind: input, shape index: {}]   ;;  %s1336_s6 = inlined_call_operand.vmem [shape: f32[2,4,256], index: 6, kind: output, shape index: {}]  }
   0x1 LB: > { %s865_s22 = sadd.s32 4294967295, %s1052_s21   ;;  %p869_p0 = scmp.ge.s32.totalorder %s1052_s21, 1  ;;  %s1052_s21 = sphi %s1127_s21, %s16_s21  }
   0x2   : > { %p212_p1 = scmp.lt.s32.totalorder %s1052_s21, 3 }
   0x4   : > { %p213_p2 = pnand %p869_p0, %p212_p1 }
   0x5   : > { %p242_p3 = scmp.lt.s32.totalorder (!%p213_p2), %s865_s22, 1  ;;  %v1138_v0 = vld [vmem:[%s1332_s2] sm:$0xff] (!%p213_p2)  ;;  %v1143_v1 = vld [vmem:[%s1332_s2 + $0x8] sm:$0xff] (!%p213_p2)  ;;  %v1178_v8 = vld [vmem:[%s1331_s1 + $0x10] ss:$0 sm:$0xff] (!%p213_p2)  ;;  %v1193_v12 = vmov (!%p213_p2), 0.0  }
   0x6   : > { %216 = sbr.rel (%p213_p2) target bundleno = 700 (0x2bc), region = 44  ;;  %v1148_v2 = vld [vmem:[%s1333_s3] sm:$0xff] (!%p213_p2)  ;;  %v1153_v3 = vld [vmem:[%s1333_s3 + $0x8] sm:$0xff] (!%p213_p2)  ;;  %v1183_v9 = vld [vmem:[%s1331_s1 + $0x18] ss:$0 sm:$0xff] (!%p213_p2)  ;;  %v1195_v13 = vmov (!%p213_p2), 0.0  }
   0x7   : > { %v1158_v4 = vld [vmem:[%s1334_s4] sm:$0xf] (!%p213_p2)  ;;  %v1173_v7 = vld [vmem:[%s1331_s1 + $0x8] sm:$0xff] (!%p213_p2)  ;;  %v1197_v14 = vmov (!%p213_p2), 0.0   ;;  %v1199_v15 = vmov (!%p213_p2), 0.0  }
   0x8   : > { %v1163_v5 = vld [vmem:[%s1335_s5] sm:$0xf] (!%p213_p2) }
   0x9   : > { %v1168_v6 = vld [vmem:[%s1331_s1] sm:$0xff] (!%p213_p2) }
   0xd   : > { %s1340_s22 = smov (!%p242_p3, %s865_s22), 1 }
   0xe   : > { %s883_s19 = sshll.u32 %s1340_s22, 3  ;;  %s1205_s22 = smov 0  }
   0xf   : > { %s246_s24 = scalar_lea.vmem %s1330_s0, %s883_s19  ;;  %s1191_s27 = scalar_lea.vmem %s1336_s6, %s883_s19 }
  0x10   : > { %v262_v10 = vld [vmem:[%s246_s24] sm:$0xff]  }
  0x11   : > { %v264_v11 = vcombine.high %v262_v10, %v262_v10  }
  0x12 LB: >> { %vm278_vm0 = vcmask 1043456   ;;  %s1082_s28 = smov 16   ;;  %s1083_s29 = smov 17   ;;  %vm566_vm9 = vcmask 588800   ;;  %vm355_vm10 = vcmask 1047556   ;;  %vm701_vm11 = vcmask 31744   ;;  %s1080_s22 = sphi %s1205_s22, %s271_s22   ;;  %v1076_v10 = vphi %v262_v10, %v1338_v10   ;;  %v1072_v11 = vphi %v264_v11, %v1337_v11   ;;  %v1068_v15 = vphi %v1199_v15, %v694_v15   ;;  %v1064_v14 = vphi %v1197_v14, %v695_v14   ;;  %v1060_v13 = vphi %v1195_v13, %v684_v13   ;;  %v1056_v12 = vphi %v1193_v12, %v685_v12  }
  0x13   : >> { %v279_v16 = vsel %vm278_vm0, %v1076_v10, -inf  ;;  %v317_v17 = vsel %vm278_vm0, %v1068_v15, -inf  ;;  %v324_v18 = vsel %vm278_vm0, %v1064_v14, -inf  ;;  %v286_v21 = vsel %vm278_vm0, %v1072_v11, -inf  ;;  %s1084_s30 = smov 15   ;;  %s1085_s7 = smov 1  }
  0x14   : >> { %v280_v19 = vrot.slane %v279_v16, 4  ;;  %v318_v20 = vrot.slane %v317_v17, 4  ;;  %v325_v22 = vrot.slane %v324_v18, 4  ;;  %v287_v23 = vrot.slane %v286_v21, 4  ;;  %s1086_s8 = smov 127   ;;  %s1087_s9 = smov 113  }
  0x15   : >> { %s1089_s10 = smov 112   ;;  %s1091_s11 = smov 111  }
  0x16   : >> { %v281_v24 = vmax.f32 %v279_v16, %v280_v19  ;;  %v319_v25 = vmax.f32 %v317_v17, %v318_v20  ;;  %v326_v26 = vmax.f32 %v324_v18, %v325_v22  ;;  %v288_v27 = vmax.f32 %v286_v21, %v287_v23  ;;  %s271_s22 = sadd.s32 1, %s1080_s22  }
  0x17   : >> { %p268_p4 = scmp.ge.s32.totalorder %s271_s22, 2  }
  0x18   : >> { %v282_v28 = vrot.slane %v281_v24, 2  ;;  %v320_v29 = vrot.slane %v319_v25, 2  ;;  %v327_v30 = vrot.slane %v326_v26, 2  ;;  %v289_v31 = vrot.slane %v288_v27, 2 }
  0x1a   : >> { %v283_v32 = vmax.f32 %v281_v24, %v282_v28  ;;  %v321_v33 = vmax.f32 %v319_v25, %v320_v29  ;;  %v328_v34 = vmax.f32 %v326_v26, %v327_v30  ;;  %v290_v35 = vmax.f32 %v288_v27, %v289_v31 }
  0x1c   : >> { %v284_v36 = vrot.slane %v283_v32, 1  ;;  %v322_v37 = vrot.slane %v321_v33, 1  ;;  %v329_v38 = vrot.slane %v328_v34, 1  ;;  %v291_v39 = vrot.slane %v290_v35, 1 }
  0x1e   : >> { %v285_v40 = vmax.f32 %v283_v32, %v284_v36  ;;  %v323_v41 = vmax.f32 %v321_v33, %v322_v37  ;;  %v330_v42 = vmax.f32 %v328_v34, %v329_v38  ;;  %v292_v43 = vmax.f32 %v290_v35, %v291_v39 }
  0x20   : >> { %v293_v44 = vsub.f32 %v1076_v10, %v285_v40  ;;  %v331_v45 = vsub.f32 %v1068_v15, %v323_v41  ;;  %v332_v46 = vsub.f32 %v1064_v14, %v330_v42  ;;  %v294_v47 = vsub.f32 %v1072_v11, %v292_v43 }
  0x22   : >> { %v295_v48 = vmul.f32 1.442695, %v293_v44  ;;  %v333_v49 = vmul.f32 1.442695, %v331_v45  ;;  %v297_v50 = vmul.f32 1.442695, %v294_v47 }
  0x23   : >> { %v335_v51 = vmul.f32 1.442695, %v332_v46  ;;  %v1088_v44 = vmov 0.0   ;;  %v1090_v45 = vmov 0   ;;  %v412_v46 = vlaneseq }
  0x24   : >> { %978 = vpow2.f32 %v295_v48  ;;  %637 = vmatprep.mubr.f32.mxu0 %v1088_v44  ;;  %775 = vmatprep.mubr.f32.mxu1 %v1088_v44 }
  0x25   : >> { %980 = vpow2.f32 %v333_v49  ;;  %976 = vset.pattern.permute.xlu0 %v1090_v45  ;;  %977 = vset.pattern.permute.xlu1 %v1090_v45  ;;  %v1255_v47 = vshrl.u32 %v412_v46, 7  ;;  %v1257_v48 = vand.u32 127, %v412_v46 }
  0x26   : >> { %982 = vpow2.f32 %v297_v50 }
  0x27   : >> { %984 = vpow2.f32 %v335_v51  ;;  %v436_v49 = vsub.s32 1, %v1255_v47  ;;  %v419_v50 = vsub.s32 0, %v1255_v47  ;;  %vm431_vm1 = vcmp.lt.s32.totalorder %v1257_v48, 16 }
  0x28   : >> { %vm414_vm2 = vcmp.lt.s32.totalorder %v1257_v48, 17  ;;  %vm448_vm3 = vcmp.lt.s32.totalorder %v1257_v48, 15  ;;  %vm465_vm4 = vcmp.lt.s32.totalorder %v1257_v48, 1  ;;  %vm492_vm5 = vcmp.lt.s32.totalorder %v1257_v48, 127 }
  0x29   : >> { %vm509_vm6 = vcmp.lt.s32.totalorder %v1257_v48, 113  ;;  %vm526_vm7 = vcmp.lt.s32.totalorder %v1257_v48, 112  ;;  %vm543_vm8 = vcmp.lt.s32.totalorder %v1257_v48, 111  ;;  %v356_v48 = vsel %vm355_vm10, %v1060_v13, -inf }
  0x2e   : >> { %v979_v52 = vpop.eup %978 }
  0x2f   : >> { %v981_v53 = vpop.eup %980  ;;  %v299_v54 = vsel %vm278_vm0, %v979_v52, 0.0 }
  0x30   : >> { %v983_v55 = vpop.eup %982  ;;  %v300_v56 = vrot.slane %v299_v54, 4  ;;  %v337_v57 = vsel %vm278_vm0, %v981_v53, 0.0 }
  0x31   : >> { %v985_v58 = vpop.eup %984  ;;  %v338_v59 = vrot.slane %v337_v57, 4  ;;  %v306_v60 = vsel %vm278_vm0, %v983_v55, 0.0 }
  0x32   : >> { %v301_v61 = vadd.f32 %v300_v56, %v299_v54  ;;  %v307_v62 = vrot.slane %v306_v60, 4  ;;  %v344_v63 = vsel %vm278_vm0, %v985_v58, 0.0  ;;  %v420_v54 = vrot.slane %v1168_v6, %v419_v50 }
  0x33   : >> { %v339_v10 = vadd.f32 %v338_v59, %v337_v57  ;;  %v345_v11 = vrot.slane %v344_v63, 4  ;;  %v441_v56 = vrot.slane %v1173_v7, %v436_v49  ;;  %v453_v59 = vsub.s32 2, %v1255_v47 }
  0x34   : >> { %v302_v14 = vrot.slane %v301_v61, 2  ;;  %v308_v15 = vadd.f32 %v307_v62, %v306_v60  ;;  %v470_v60 = vsub.s32 3, %v1255_v47 }
  0x35   : >> { %v340_v16 = vrot.slane %v339_v10, 2  ;;  %v346_v17 = vadd.f32 %v345_v11, %v344_v63 }
  0x36   : >> { %v303_v18 = vadd.f32 %v302_v14, %v301_v61  ;;  %v309_v19 = vrot.slane %v308_v15, 2 }
  0x37   : >> { %v341_v20 = vadd.f32 %v340_v16, %v339_v10  ;;  %v347_v21 = vrot.slane %v346_v17, 2 }
  0x38   : >> { %v304_v22 = vrot.slane %v303_v18, 1  ;;  %v310_v23 = vadd.f32 %v309_v19, %v308_v15 }
  0x39   : >> { %v342_v24 = vrot.slane %v341_v20, 1  ;;  %v348_v25 = vadd.f32 %v347_v21, %v346_v17  ;;  %v480_v21 = vsub.s32 4, %v1255_v47 }
  0x3a   : >> { %v305_v26 = vadd.f32 %v304_v22, %v303_v18  ;;  %v311_v27 = vrot.slane %v310_v23, 1  ;;  %v454_v22 = vrot.slane %v1168_v6, %v453_v59 }
  0x3b   : >> { %v343_v28 = vadd.f32 %v342_v24, %v341_v20  ;;  %v349_v29 = vrot.slane %v348_v25, 1  ;;  %v458_v24 = vrot.slane %v1173_v7, %v453_v59 }
  0x3c   : >> { %986 = vrcp.f32 %v305_v26  ;;  %v312_v30 = vadd.f32 %v311_v27, %v310_v23  ;;  %v497_v23 = vsub.s32 5, %v1255_v47  ;;  %v475_v26 = vrot.slane %v1173_v7, %v470_v60 }
  0x3d   : >> { %988 = vrcp.f32 %v343_v28  ;;  %v350_v31 = vadd.f32 %v349_v29, %v348_v25  ;;  %v471_v25 = vrot.slane %v1168_v6, %v470_v60 }
  0x3e   : >> { %990 = vrcp.f32 %v312_v30 }
  0x3f   : >> { %992 = vrcp.f32 %v350_v31  ;;  %v485_v31 = vrot.slane %v1173_v7, %v480_v21 }
  0x46   : >> { %v987_v32 = vpop.eup %986 }
  0x47   : >> { %v989_v33 = vpop.eup %988  ;;  %v314_v35 = vmul.f32 %v987_v32, %v979_v52  ;;  %v481_v32 = vrot.slane %v1168_v6, %v480_v21 }
  0x48   : >> { %v991_v34 = vpop.eup %990  ;;  %v352_v36 = vmul.f32 %v989_v33, %v981_v53  ;;  %v437_v53 = vrot.slane %v1168_v6, %v436_v49 }
  0x49   : >> { %v993_v37 = vpop.eup %992  ;;  %v316_v39 = vmul.f32 %v991_v34, %v983_v55  ;;  %v424_v55 = vrot.slane %v1173_v7, %v419_v50 }
  0x4a   : >> { %v402_v38 = vrot.slane %v352_v36, 4  ;;  %v354_v40 = vmul.f32 %v993_v37, %v985_v58  ;;  %v502_v36 = vrot.slane %v1173_v7, %v497_v23 }
  0x4c   : >> { %v1229_v41 = vsel %vm278_vm0, %v314_v35, %v402_v38  ;;  %v403_v42 = vrot.slane %v354_v40, 4  ;;  %v498_v35 = vrot.slane %v1168_v6, %v497_v23 }
  0x4d   : >> { %427 = vrot.lane.b32.xlu1 %v1229_v41, %s1082_s28  ;;  %408 = vrot.lane.b32.xlu0 %v1229_v41, %s1083_s29 }
  0x4e   : >> { %v1234_v43 = vsel %vm278_vm0, %v316_v39, %v403_v42 }
  0x4f   : >> { %v487_v50 = vmul.f32 %v485_v31, %v1234_v43 }
  0x51   : >> { %429 = vrot.lane.b32.xlu1 %v1234_v43, %s1082_s28  ;;  %410 = vrot.lane.b32.xlu0 %v1234_v43, %s1083_s29 }
  0x55   : >> { %446 = vrot.lane.b32.xlu1 %v1234_v43, %s1084_s30  ;;  %444 = vrot.lane.b32.xlu0 %v1229_v41, %s1084_s30 }
  0x59   : >> { %463 = vrot.lane.b32.xlu1 %v1234_v43, %s1085_s7  ;;  %461 = vrot.lane.b32.xlu0 %v1229_v41, %s1085_s7 }
  0x5d   : >> { %490 = vrot.lane.b32.xlu1 %v1234_v43, %s1086_s8  ;;  %488 = vrot.lane.b32.xlu0 %v1229_v41, %s1086_s8 }
  0x61   : >> { %507 = vrot.lane.b32.xlu1 %v1234_v43, %s1087_s9  ;;  %505 = vrot.lane.b32.xlu0 %v1229_v41, %s1087_s9 }
  0x65   : >> { %524 = vrot.lane.b32.xlu1 %v1234_v43, %s1089_s10  ;;  %522 = vrot.lane.b32.xlu0 %v1229_v41, %s1089_s10 }
  0x69   : >> { %541 = vrot.lane.b32.xlu1 %v1234_v43, %s1091_s11  ;;  %539 = vrot.lane.b32.xlu0 %v1229_v41, %s1091_s11 }
  0x6d   : >> { %558 = vperm.xlu0 %976, %v1148_v2   ;;  %563 = vperm.xlu1 %977, %v1153_v3  }
  0x71   : >> { %698 = vperm.xlu1 %977, %v1163_v5  }
  0xbf   : >> { %v428_v51 = vpop.permute.xlu1 %427  ;;  %v409_v52 = vpop.permute.xlu0 %408 }
  0xc3   : >> { %v430_v57 = vpop.permute.xlu1 %429  ;;  %v411_v58 = vpop.permute.xlu0 %410 }
  0xc4   : >> { %v432_v61 = vsel %vm431_vm1, %v428_v51, %v430_v57  ;;  %v433_v62 = vsel %vm431_vm1, %v430_v57, %v428_v51  ;;  %v415_v63 = vsel %vm414_vm2, %v409_v52, %v411_v58  ;;  %v416_v10 = vsel %vm414_vm2, %v411_v58, %v409_v52 }
  0xc5   : >> { %v442_v11 = vmul.f32 %v437_v53, %v433_v62  ;;  %v425_v14 = vmul.f32 %v420_v54, %v416_v10  ;;  %v426_v15 = vmul.f32 %v424_v55, %v415_v63  ;;  %v443_v16 = vmul.f32 %v441_v56, %v432_v61 }
  0xc6   : >> { %v486_v51 = vmul.f32 %v481_v32, %v1229_v41  ;;  %v514_v54 = vsub.s32 6, %v1255_v47  ;;  %v531_v57 = vsub.s32 7, %v1255_v47 }
  0xc7   : >> { %v447_v17 = vpop.permute.xlu1 %446  ;;  %v445_v18 = vpop.permute.xlu0 %444  ;;  %v885_v19 = vpack.c.bf16 %v443_v16, %v426_v15  ;;  %v887_v20 = vpack.c.bf16 %v442_v11, %v425_v14 }
  0xc8   : >> { %v449_v27 = vsel %vm448_vm3, %v445_v18, %v447_v17  ;;  %v450_v28 = vsel %vm448_vm3, %v447_v17, %v445_v18  ;;  %v515_v60 = vrot.slane %v1168_v6, %v514_v54  ;;  %v519_v61 = vrot.slane %v1173_v7, %v514_v54 }
  0xc9   : >> { %886 = vmatprep.subr.bf16.mxu0 %v885_v19  ;;  %v459_v37 = vmul.f32 %v454_v22, %v450_v28  ;;  %v460_v38 = vmul.f32 %v458_v24, %v449_v27  ;;  %v532_v62 = vrot.slane %v1168_v6, %v531_v57  ;;  %v536_v63 = vrot.slane %v1173_v7, %v531_v57 }
  0xca   : >> { %888 = vmatpush1.bf16.msra.mxu0 %v887_v20 }
  0xcb   : >> { %v464_v29 = vpop.permute.xlu1 %463  ;;  %v462_v30 = vpop.permute.xlu0 %461 }
  0xcc   : >> { %v466_v33 = vsel %vm465_vm4, %v462_v30, %v464_v29  ;;  %v467_v34 = vsel %vm465_vm4, %v464_v29, %v462_v30  ;;  %v363_v29 = vsel %vm355_vm10, %v1056_v12, -inf  ;;  %v357_v30 = vrot.slane %v356_v48, 4 }
  0xcd   : >> { %v476_v39 = vmul.f32 %v471_v25, %v467_v34  ;;  %v477_v40 = vmul.f32 %v475_v26, %v466_v33  ;;  %v364_v31 = vrot.slane %v363_v29, 4 }
  0xce   : >> { %v358_v32 = vmax.f32 %v356_v48, %v357_v30 }
  0xcf   : >> { %v491_v42 = vpop.permute.xlu1 %490  ;;  %v489_v45 = vpop.permute.xlu0 %488  ;;  %v889_v46 = vpack.c.bf16 %v477_v40, %v460_v38  ;;  %v891_v49 = vpack.c.bf16 %v476_v39, %v459_v37  ;;  %v365_v33 = vmax.f32 %v363_v29, %v364_v31 }
  0xd0   : >> { %v493_v52 = vsel %vm492_vm5, %v489_v45, %v491_v42  ;;  %v494_v53 = vsel %vm492_vm5, %v491_v42, %v489_v45  ;;  %v359_v34 = vrot.slane %v358_v32, 2 }
  0xd1   : >> { %v503_v55 = vmul.f32 %v498_v35, %v493_v52  ;;  %v504_v56 = vmul.f32 %v502_v36, %v494_v53  ;;  %890 = vmatprep.subr.bf16.mxu0 %v889_v46  ;;  %v366_v35 = vrot.slane %v365_v33, 2 }
  0xd2   : >> { %892 = vmatpush1.bf16.msra.mxu0 %v891_v49  ;;  %v360_v36 = vmax.f32 %v358_v32, %v359_v34 }
  0xd3   : >> { %v508_v58 = vpop.permute.xlu1 %507  ;;  %v506_v43 = vpop.permute.xlu0 %505  ;;  %v893_v59 = vpack.c.bf16 %v504_v56, %v487_v50  ;;  %v895_v41 = vpack.c.bf16 %v503_v55, %v486_v51  ;;  %v367_v37 = vmax.f32 %v365_v33, %v366_v35 }
  0xd4   : >> { %v510_v10 = vsel %vm509_vm6, %v506_v43, %v508_v58  ;;  %v511_v47 = vsel %vm509_vm6, %v508_v58, %v506_v43  ;;  %v361_v38 = vrot.slane %v360_v36, 1 }
  0xd5   : >> { %894 = vmatprep.subr.bf16.mxu0 %v893_v59  ;;  %v520_v17 = vmul.f32 %v515_v60, %v510_v10  ;;  %v521_v18 = vmul.f32 %v519_v61, %v511_v47  ;;  %v368_v39 = vrot.slane %v367_v37, 1 }
  0xd6   : >> { %896 = vmatpush1.bf16.msra.mxu0 %v895_v41  ;;  %v362_v40 = vmax.f32 %v360_v36, %v361_v38 }
  0xd7   : >> { %v525_v11 = vpop.permute.xlu1 %524  ;;  %v523_v14 = vpop.permute.xlu0 %522  ;;  %v369_v42 = vmax.f32 %v367_v37, %v368_v39 }
  0xd8   : >> { %v527_v15 = vsel %vm526_vm7, %v523_v14, %v525_v11  ;;  %v528_v16 = vsel %vm526_vm7, %v525_v11, %v523_v14 }
  0xd9   : >> { %v537_v19 = vmul.f32 %v532_v62, %v527_v15  ;;  %v538_v20 = vmul.f32 %v536_v63, %v528_v16  ;;  %v371_v45 = vsub.f32 %v1056_v12, %v369_v42 }
  0xdb   : >> { %v542_v21 = vpop.permute.xlu1 %541  ;;  %v540_v22 = vpop.permute.xlu0 %539  ;;  %v897_v23 = vpack.c.bf16 %v538_v20, %v521_v18  ;;  %v899_v24 = vpack.c.bf16 %v537_v19, %v520_v17  ;;  %v374_v49 = vmul.f32 1.442695, %v371_v45 }
  0xdc   : >> { %v544_v25 = vsel %vm543_vm8, %v540_v22, %v542_v21  ;;  %v545_v26 = vsel %vm543_vm8, %v542_v21, %v540_v22 }
  0xdd   : >> { %v555_v27 = vmul.f32 %v1183_v9, %v545_v26  ;;  %898 = vmatprep.subr.bf16.mxu0 %v897_v23  ;;  %v554_v28 = vmul.f32 %v1178_v8, %v544_v25 }
  0xde   : >> { %900 = vmatpush1.bf16.msra.mxu0 %v899_v24 }
  0xdf   : >> { %589 = vmatprep.subr.mxu0 %v555_v27 }
  0xe2   : >> { %590 = vmatpush1.msra.mxu0 %v554_v28 }
  0xe3   : >> { %876 = vmatmul.mubr.msk.f32.vlgmr.msra.gmra.mrb[0].mxu0 %vm566_vm9, %v1138_v0 }
  0xe4   : >> { %643 = vmatprep.mubr.f32.mxu0 %v1088_v44  ;;  %v370_v44 = vsub.f32 %v1060_v13, %v362_v40 }
  0xe6   : >> { %v372_v46 = vmul.f32 1.442695, %v370_v44 }
  0xe7   : >> { %877 = vmatmul.mubr.msk.f32.gmra.mrb[2].mxu0 %vm566_vm9, %v1143_v1 }
  0xe8   : >> { %994 = vpow2.f32 %v372_v46 }
  0xe9   : >> { %996 = vpow2.f32 %v374_v49 }
  0xec   : >> { %v559_v62 = vpop.permute.xlu0 %558  ;;  %v564_v17 = vpop.permute.xlu1 %563 }
  0xf2   : >> { %v995_v50 = vpop.eup %994 }
  0xf3   : >> { %v997_v51 = vpop.eup %996  ;;  %v378_v52 = vrot.slane %v995_v50, 4 }
  0xf4   : >> { %v379_v53 = vrot.slane %v997_v51, 4 }
  0xf5   : >> { %v382_v54 = vsel %vm278_vm0, %v378_v52, 0.0 }
  0xf6   : >> { %v389_v55 = vsel %vm278_vm0, %v379_v53, 0.0  ;;  %v383_v56 = vrot.slane %v382_v54, 4 }
  0xf7   : >> { %v390_v57 = vrot.slane %v389_v55, 4 }
  0xf8   : >> { %v384_v58 = vadd.f32 %v383_v56, %v382_v54 }
  0xf9   : >> { %v391_v43 = vadd.f32 %v390_v57, %v389_v55 }
  0xfa   : >> { %v385_v59 = vrot.slane %v384_v58, 2 }
  0xfb   : >> { %v392_v13 = vrot.slane %v391_v43, 2 }
  0xfc   : >> { %v386_v41 = vadd.f32 %v385_v59, %v384_v58  ;;  %v699_v58 = vpop.permute.xlu1 %698 }
  0xfd   : >> { %v393_v12 = vadd.f32 %v392_v13, %v391_v43 }
  0xfe   : >> { %v387_v60 = vrot.slane %v386_v41, 1 }
  0xff   : >> { %v394_v61 = vrot.slane %v393_v12, 1 }
 0x100   : >> { %v388_v63 = vadd.f32 %v387_v60, %v386_v41 }
 0x101   : >> { %v395_v47 = vadd.f32 %v394_v61, %v393_v12 }
 0x102   : >> { %998 = vrcp.f32 %v388_v63 }
 0x103   : >> { %1000 = vrcp.f32 %v395_v47 }
 0x10c   : >> { %v999_v23 = vpop.eup %998 }
 0x10d   : >> { %v1001_v24 = vpop.eup %1000  ;;  %v397_v32 = vmul.f32 %v999_v23, %v995_v50 }
 0x10e   : >> { %v399_v35 = vmul.f32 %v1001_v24, %v997_v51 }
 0x1b6   : >> { %v639_v10 = vpop.f32.mrb[0].mxu0 }
 0x1b7   : >> { %v640_v11 = vadd.f32 %v639_v10, %v559_v62  ;;  %v641_v14 = vpop.f32.mrb[1].mxu0 }
 0x1b8   : >> { %v642_v15 = vadd.f32 %v641_v14, %v559_v62 }
 0x1b9   : >> { %v650_v16 = vmul.f32 0.5, %v640_v11 }
 0x1ba   : >> { %v651_v18 = vmul.f32 0.5, %v642_v15  ;;  %v645_v19 = vpop.f32.mrb[2].mxu0 }
 0x1bb   : >> { %1002 = vtanh.f32 %v650_v16  ;;  %v646_v20 = vadd.f32 %v645_v19, %v564_v17  ;;  %v647_v21 = vpop.f32.mrb[3].mxu0 }
 0x1bc   : >> { %1004 = vtanh.f32 %v651_v18  ;;  %v648_v22 = vadd.f32 %v647_v21, %v564_v17 }
 0x1bd   : >> { %1006 = vtanh.f32 %v646_v20  ;;  %v658_v28 = vmul.f32 0.5, %v646_v20 }
 0x1be   : >> { %1008 = vtanh.f32 %v648_v22  ;;  %v659_v30 = vmul.f32 0.5, %v648_v22 }
 0x1bf   : >> { %1010 = vtanh.f32 %v658_v28 }
 0x1c0   : >> { %1012 = vtanh.f32 %v659_v30 }
 0x1c5   : >> { %v1003_v25 = vpop.eup %1002 }
 0x1c6   : >> { %v1005_v26 = vpop.eup %1004  ;;  %v654_v27 = vadd.f32 1.0, %v1003_v25 }
 0x1c7   : >> { %v1007_v48 = vpop.eup %1006  ;;  %v655_v29 = vadd.f32 1.0, %v1005_v26 }
 0x1c8   : >> { %v1009_v31 = vpop.eup %1008  ;;  %v656_v33 = vmul.f32 0.5, %v654_v27  ;;  %v672_v34 = vrot.slane %v1007_v48, 4 }
 0x1c9   : >> { %v657_v36 = vmul.f32 0.5, %v655_v29  ;;  %v673_v37 = vrot.slane %v1009_v31, 4  ;;  %v1011_v46 = vpop.eup %1010 }
 0x1ca   : >> { %v676_v38 = vmul.f32 %v672_v34, %v656_v33  ;;  %v668_v40 = vmul.f32 %v656_v33, %v397_v32  ;;  %v1013_v49 = vpop.eup %1012  ;;  %v662_v50 = vadd.f32 1.0, %v1011_v46 }
 0x1cb   : >> { %v677_v39 = vmul.f32 %v673_v37, %v657_v36  ;;  %v669_v44 = vmul.f32 %v657_v36, %v399_v35  ;;  %v663_v52 = vadd.f32 1.0, %v1013_v49 }
 0x1cc   : >> { %v680_v42 = vrot.slane %v676_v38, 4  ;;  %v664_v54 = vmul.f32 0.5, %v662_v50 }
 0x1cd   : >> { %v681_v45 = vrot.slane %v677_v39, 4  ;;  %v665_v56 = vmul.f32 0.5, %v663_v52 }
 0x1ce   : >> { %v684_v13 = vadd.f32 %v680_v42, %v668_v40  }
 0x1cf   : >> { %v685_v12 = vadd.f32 %v681_v45, %v669_v44  }
 0x1d0   : >> { %1014 = vtanh.f32 %v684_v13 }
 0x1d1   : >> { %1016 = vtanh.f32 %v685_v12 }
 0x1da   : >> { %v1015_v53 = vpop.eup %1014 }
 0x1db   : >> { %v1017_v51 = vpop.eup %1016  ;;  %v690_v55 = vrot.slane %v1015_v53, 4 }
 0x1dc   : >> { %v691_v57 = vrot.slane %v1017_v51, 4 }
 0x1dd   : >> { %v694_v15 = vmul.f32 %v690_v55, %v664_v54  }
 0x1de   : >> { %v695_v14 = vmul.f32 %v691_v57, %v665_v56  }
 0x1e0   : >> { %878 = vmatprep.subr.msk.mxu1 %vm278_vm0, %v695_v14 }
 0x1e1   : >> { %879 = vmatpush1.msk.msra.mxu1 %vm278_vm0, %v694_v15 }
 0x1e2   : >> { %880 = vmatmul.mubr.msk.f32.vlgmr.msra.gmra.mrb[0].mxu1 %vm701_vm11, %v1158_v4 }
 0x2b3   : > { %270 = sbr.rel (!%p268_p4) target bundleno = 18 (0x12), region = 81 }
 0x2b5   : >> { %v777_v43 = vpop.f32.mrb[0].mxu1 }
 0x2b6   : >> { %v778_v59 = vadd.f32 %v777_v43, %v699_v58   ;;  %v779_v41 = vpop.f32.mrb[1].mxu1 }
 0x2b7   : >> { %v780_v60 = vadd.f32 %v779_v41, %v699_v58  }
 0x2b8   : >> { %v1338_v10 = vmov %v778_v59 }
 0x2b9   : >> { %v1337_v11 = vmov %v780_v60  ;;  %v784_v61 = vcombine.low (%p268_p4), %v778_v59, %v780_v60 }
 0x2bb   : > { %786 = vst [vmem:[%s1191_s27] sm:$0xff] %v784_v61 }
 0x2bc PF: > { %s16_s21 = sadd.s32 1, %s1052_s21  }
 0x2bd   : > { %p13_p5 = scmp.ge.s32.totalorder %s16_s21, 4  }
 0x2bf   :  { %15 = sbr.rel (!%p13_p5) target bundleno = 1 (0x1), region = 92 }

</bundles_post_ra>
